<compile_context>
chip_gen: v7x
topology: tpu7x:2x2x1
jax: 0.10.0
libtpu: 0.0.40
codegen_flags: <defaults>
</compile_context>

<pallas_src>
import jax
import jax.numpy as jnp
from jax.experimental import pallas as pl
from jax.experimental.pallas import tpu as pltpu


def _softplus(z):
    # Matches torch.nn.Softplus(beta=1, threshold=20): identity for z > 20.
    return jnp.where(z > 20.0, z, jnp.log1p(jnp.exp(jnp.minimum(z, 20.0))))


def _full_spec(shape):
    # Whole-array block; block == full array extent satisfies the (8,128) tiling rule.
    return pl.BlockSpec(shape, lambda *_: (0,) * len(shape))


# ---------------------------------------------------------------------------
# Single fused kernel: wg-MLP + fuse_weight + V view-MLPs + weighted combine
# ---------------------------------------------------------------------------
def _fused_forward_kernel(x0_ref, wg1_ref, bg1_ref, wg2_ref, bg2_ref,
                          xs_ref, w1s_ref, b1s_ref, w2s_ref, b2s_ref,
                          noise_ref, ep_ref, o_ref):
    V = w1s_ref.shape[0]
    B = x0_ref.shape[0]
    C = w2s_ref.shape[2]

    # ---- weight-generator MLP: Linear(D0,256) -> ReLU -> Linear(256,V) -> Softplus
    h0 = jnp.dot(x0_ref[...], wg1_ref[...], preferred_element_type=jnp.float32)
    h0 = jnp.maximum(h0 + bg1_ref[...], 0.0)
    wg = _softplus(jnp.dot(h0, wg2_ref[...], preferred_element_type=jnp.float32)
                   + bg2_ref[...])                                    # (B, V)

    # ---- fuse_weight = softplus(noise * min(0.5*wg, 1) + e_parameters)
    std = jnp.minimum(wg * 0.5, 1.0)
    fw = _softplus(noise_ref[...] * std + ep_ref[...])                # (B, V)

    # ---- all V EvidenceCollectors as one batched matmul stream (zero-padded)
    hv = jnp.einsum('vbd,vdh->vbh', xs_ref[...], w1s_ref[...],
                    preferred_element_type=jnp.float32) + b1s_ref[...]
    hv = jnp.maximum(hv, 0.0)                                         # (V, B, Hmax)
    ev = _softplus(jnp.einsum('vbh,vhc->vbc', hv, w2s_ref[...],
                              preferred_element_type=jnp.float32)
                   + b2s_ref[...])                                    # (V, B, C)

    # ---- weighted combine, unrolled over the small static view count
    pieces = []
    acc = jnp.zeros((B, C), jnp.float32)
    for v in range(V):
        e_v = ev[v]                                                   # (B, C)
        acc = acc + e_v * fw[:, v:v + 1]
        pieces.append(e_v)

    # ---- single lane-dense store: [ev_0 | ... | ev_{V-1} | wg | evidence_a | 0-pad]
    pieces.append(wg)
    pieces.append(acc)
    pad = o_ref.shape[1] - (V * C + V + C)
    if pad > 0:
        pieces.append(jnp.zeros((B, pad), jnp.float32))
    o_ref[...] = jnp.concatenate(pieces, axis=-1)


def fused_forward(x0, wg1, bg1, wg2, bg2, xs, w1s, b1s, w2s, b2s, noise, ep,
                  slab_width):
    B = x0.shape[0]
    args = (x0, wg1, bg1, wg2, bg2, xs, w1s, b1s, w2s, b2s, noise, ep)
    return pl.pallas_call(
        _fused_forward_kernel,
        out_shape=jax.ShapeDtypeStruct((B, slab_width), jnp.float32),
        grid=(1,),
        in_specs=[_full_spec(a.shape) for a in args],
        out_specs=_full_spec((B, slab_width)),
        compiler_params=pltpu.CompilerParams(
            dimension_semantics=("arbitrary",)),
    )(*args)


# ---------------------------------------------------------------------------
# XLA-side glue around the single Pallas call (pad/stack X, slice output slab)
# ---------------------------------------------------------------------------
@jax.jit
def _forward_impl(x_list, wg1, bg1, wg2, bg2, w1s, b1s, w2s, b2s, e_params, noise):
    V, d_max, _ = w1s.shape
    C = w2s.shape[2]
    xs = jnp.stack([jnp.pad(x, ((0, 0), (0, d_max - x.shape[1]))) for x in x_list])
    total = V * C + V + C
    slab_w = ((total + 127) // 128) * 128            # lane-dense, 128-multiple width
    slab = fused_forward(x_list[0], wg1, bg1, wg2, bg2, xs, w1s, b1s, w2s, b2s,
                         noise, e_params.reshape(1, V), slab_w)
    evs = tuple(slab[:, v * C:(v + 1) * C] for v in range(V))
    wg = slab[:, V * C:V * C + V]
    evidence_a = slab[:, V * C + V:V * C + V + C]
    return evs, wg, evidence_a


# ---------------------------------------------------------------------------
# Model wrapper (parameter setup is plain-JAX glue, done once at init)
# ---------------------------------------------------------------------------
class NormalRCML:
    """JAX/Pallas port of Normal_RCML (forward pass only)."""

    def __init__(self, num_views, dims, num_classes, key):
        # nn.Parameter in the PyTorch module; used in the fuse_weight reparameterization.
        self.e_parameters = jnp.array([0.291, 0.1555, 0.1661, 0.1386, 0.1071, 0.1417],
                                      jnp.float32)
        # The (B,V) + (6,) broadcast in the reference forward requires V == 6.
        assert num_views == self.e_parameters.shape[0], \
            "Normal_RCML's e_parameters has length 6 -> num_views must be 6"

        self.num_views = num_views
        self.num_classes = num_classes
        self.dims = dims

        def linear_init(k, fan_in, fan_out):
            kw, kb = jax.random.split(k)
            bound = 1.0 / jnp.sqrt(jnp.float32(fan_in))
            w = jax.random.uniform(kw, (fan_in, fan_out), jnp.float32, -bound, bound)
            b = jax.random.uniform(kb, (1, fan_out), jnp.float32, -bound, bound)
            return w, b

        keys = jax.random.split(key, 2 * num_views + 2)

        # Per-view EvidenceCollector params: Linear(D_v,H_v) + Linear(H_v,C).
        # TODO(synk): EvidenceCollector stacks deeper than one hidden layer
        # (len(dims[v]) > 2) are not implemented.
        self.view_params = []
        for v in range(num_views):
            d_in, hid = dims[v]
            w1, b1 = linear_init(keys[2 * v], d_in, hid)
            w2, b2 = linear_init(keys[2 * v + 1], hid, num_classes)
            self.view_params.append((w1, b1, w2, b2))

        # Weight-generator MLP params: Linear(D_0, 256) + Linear(256, V)
        d0 = dims[0][0]
        self.wg1, self.bg1 = linear_init(keys[-2], d0, 256)
        self.wg2, self.bg2 = linear_init(keys[-1], 256, num_views)

        # Stack + zero-pad per-view weights ONCE so the kernel runs all views as a
        # single batched einsum stream (zero padding contributes exactly zero).
        d_max = max(dims[v][0] for v in range(num_views))
        h_max = max(dims[v][1] for v in range(num_views))
        w1s, b1s, w2s, b2s = [], [], [], []
        for v in range(num_views):
            w1, b1, w2, b2 = self.view_params[v]
            d_in, hid = dims[v]
            w1s.append(jnp.pad(w1, ((0, d_max - d_in), (0, h_max - hid))))
            b1s.append(jnp.pad(b1, ((0, 0), (0, h_max - hid))))
            w2s.append(jnp.pad(w2, ((0, h_max - hid), (0, 0))))
            b2s.append(b2)
        self.w1s = jnp.stack(w1s)   # (V, Dmax, Hmax)
        self.b1s = jnp.stack(b1s)   # (V, 1, Hmax)
        self.w2s = jnp.stack(w2s)   # (V, Hmax, C)
        self.b2s = jnp.stack(b2s)   # (V, 1, C)

    def forward(self, X, key):
        # torch draws fuse-noise from the CUDA RNG; here it is an explicit PRNG key.
        B = X[0].shape[0]
        noise = jax.random.normal(key, (B, self.num_views), jnp.float32)
        evs, wg, evidence_a = _forward_impl(list(X), self.wg1, self.bg1, self.wg2,
                                            self.bg2, self.w1s, self.b1s, self.w2s,
                                            self.b2s, self.e_parameters, noise)
        evidences = {v: evs[v] for v in range(self.num_views)}
        evidences['wg'] = wg
        return evidences, evidence_a


# ---------------------------------------------------------------------------
# Pure-JAX reference (correctness sanity check, same noise draw)
# ---------------------------------------------------------------------------
def _ref_mlp2(x, w1, b1, w2, b2):
    h = jnp.maximum(x @ w1 + b1, 0.0)
    return _softplus(h @ w2 + b2)


def _ref_forward(model, X, noise):
    wg = _ref_mlp2(X[0], model.wg1, model.bg1, model.wg2, model.bg2)
    std = jnp.minimum(wg * 0.5, 1.0)
    fw = _softplus(noise * std + model.e_parameters[None, :])
    evs = [_ref_mlp2(X[v], *model.view_params[v]) for v in range(model.num_views)]
    ev_a = sum(evs[v] * fw[:, v:v + 1] for v in range(model.num_views))
    return evs, wg, ev_a


if __name__ == "__main__":
    B = 8
    num_views = 6              # fixed by e_parameters (length 6) in the reference module
    num_classes = 10
    hidden = 32
    dims = [[20, hidden], [24, hidden], [28, hidden],
            [32, hidden], [36, hidden], [40, hidden]]

    key = jax.random.PRNGKey(0)
    keys = jax.random.split(key, num_views + 2)
    X = [jax.random.normal(keys[v], (B, dims[v][0]), jnp.float32)
         for v in range(num_views)]
    noise_key = keys[-2]

    model = NormalRCML(num_views, dims, num_classes, key=keys[-1])

    evidences, evidence_a = model.forward(X, noise_key)
    evidence_a = jax.block_until_ready(evidence_a)
    for v in range(num_views):
        jax.block_until_ready(evidences[v])
    jax.block_until_ready(evidences['wg'])

    # correctness vs. pure-JAX reference using the same noise draw
    noise = jax.random.normal(noise_key, (B, num_views), jnp.float32)
    ref_evs, ref_wg, ref_a = _ref_forward(model, X, noise)
    assert jnp.allclose(evidences['wg'], ref_wg, atol=2e-5, rtol=1e-5)
    for v in range(num_views):
        assert jnp.allclose(evidences[v], ref_evs[v], atol=2e-5, rtol=1e-5)
    assert jnp.allclose(evidence_a, ref_a, atol=1e-4, rtol=1e-4)

    print("KERNEL_OK")
</pallas_src>

<mosaic_0001>
module attributes {stable_mosaic.version = 11 : i64} {
  func.func @_fused_forward_kernel(%arg0: i32, %arg1: memref<8x20xf32, #tpu.memory_space<vmem>>, %arg2: memref<20x256xf32, #tpu.memory_space<vmem>>, %arg3: memref<1x256xf32, #tpu.memory_space<vmem>>, %arg4: memref<256x6xf32, #tpu.memory_space<vmem>>, %arg5: memref<1x6xf32, #tpu.memory_space<vmem>>, %arg6: memref<6x8x40xf32, #tpu.memory_space<vmem>>, %arg7: memref<6x40x32xf32, #tpu.memory_space<vmem>>, %arg8: memref<6x1x32xf32, #tpu.memory_space<vmem>>, %arg9: memref<6x32x10xf32, #tpu.memory_space<vmem>>, %arg10: memref<6x1x10xf32, #tpu.memory_space<vmem>>, %arg11: memref<8x6xf32, #tpu.memory_space<vmem>>, %arg12: memref<1x6xf32, #tpu.memory_space<vmem>>, %arg13: memref<8x128xf32, #tpu.memory_space<vmem>>) attributes {dimension_semantics = [#tpu.dimension_semantics<arbitrary>], iteration_bounds = array<i64: 1>, scalar_prefetch = 0 : i64, scratch_operands = 0 : i64, tpu.core_type = #tpu.core_type<tc>, window_params = [{pipeline_mode = #tpu.pipeline_mode<synchronous>, transform_indices = @transform_0, window_bounds = array<i64: 8, 20>}, {pipeline_mode = #tpu.pipeline_mode<synchronous>, transform_indices = @transform_1, window_bounds = array<i64: 20, 256>}, {pipeline_mode = #tpu.pipeline_mode<synchronous>, transform_indices = @transform_2, window_bounds = array<i64: 1, 256>}, {pipeline_mode = #tpu.pipeline_mode<synchronous>, transform_indices = @transform_3, window_bounds = array<i64: 256, 6>}, {pipeline_mode = #tpu.pipeline_mode<synchronous>, transform_indices = @transform_4, window_bounds = array<i64: 1, 6>}, {pipeline_mode = #tpu.pipeline_mode<synchronous>, transform_indices = @transform_5, window_bounds = array<i64: 6, 8, 40>}, {pipeline_mode = #tpu.pipeline_mode<synchronous>, transform_indices = @transform_6, window_bounds = array<i64: 6, 40, 32>}, {pipeline_mode = #tpu.pipeline_mode<synchronous>, transform_indices = @transform_7, window_bounds = array<i64: 6, 1, 32>}, {pipeline_mode = #tpu.pipeline_mode<synchronous>, transform_indices = @transform_8, window_bounds = array<i64: 6, 32, 10>}, {pipeline_mode = #tpu.pipeline_mode<synchronous>, transform_indices = @transform_9, window_bounds = array<i64: 6, 1, 10>}, {pipeline_mode = #tpu.pipeline_mode<synchronous>, transform_indices = @transform_10, window_bounds = array<i64: 8, 6>}, {pipeline_mode = #tpu.pipeline_mode<synchronous>, transform_indices = @transform_11, window_bounds = array<i64: 1, 6>}, {pipeline_mode = #tpu.pipeline_mode<synchronous>, transform_indices = @transform_12, window_bounds = array<i64: 8, 128>}]} {
    %c0 = arith.constant 0 : index
    %c0_0 = arith.constant 0 : index
    %0 = vector.load %arg1[%c0, %c0_0] : memref<8x20xf32, #tpu.memory_space<vmem>>, vector<8x20xf32>
    %c0_1 = arith.constant 0 : index
    %c0_2 = arith.constant 0 : index
    %1 = vector.load %arg2[%c0_1, %c0_2] : memref<20x256xf32, #tpu.memory_space<vmem>>, vector<20x256xf32>
    %cst = arith.constant dense<0.000000e+00> : vector<8x256xf32>
    %2 = tpu.matmul %0, %1, %cst {dimension_numbers = #tpu.dot_dimension_numbers<[1], [0], [0], [1], [0, 0, 1, 1], [], []>} : vector<8x20xf32>, vector<20x256xf32>, vector<8x256xf32> -> vector<8x256xf32>
    %c0_3 = arith.constant 0 : index
    %c0_4 = arith.constant 0 : index
    %3 = vector.load %arg3[%c0_3, %c0_4] : memref<1x256xf32, #tpu.memory_space<vmem>>, vector<1x256xf32>
    %4 = vector.broadcast %3 : vector<1x256xf32> to vector<8x256xf32>
    %5 = arith.addf %2, %4 : vector<8x256xf32>
    %cst_5 = arith.constant 0.000000e+00 : f32
    %6 = vector.broadcast %cst_5 : f32 to vector<8x256xf32>
    %7 = arith.maximumf %5, %6 : vector<8x256xf32>
    %c0_6 = arith.constant 0 : index
    %c0_7 = arith.constant 0 : index
    %8 = vector.load %arg4[%c0_6, %c0_7] : memref<256x6xf32, #tpu.memory_space<vmem>>, vector<256x6xf32>
    %cst_8 = arith.constant dense<0.000000e+00> : vector<8x6xf32>
    %9 = tpu.matmul %7, %8, %cst_8 {dimension_numbers = #tpu.dot_dimension_numbers<[1], [0], [0], [1], [0, 0, 1, 1], [], []>} : vector<8x256xf32>, vector<256x6xf32>, vector<8x6xf32> -> vector<8x6xf32>
    %c0_9 = arith.constant 0 : index
    %c0_10 = arith.constant 0 : index
    %10 = vector.load %arg5[%c0_9, %c0_10] : memref<1x6xf32, #tpu.memory_space<vmem>>, vector<1x6xf32>
    %11 = vector.broadcast %10 : vector<1x6xf32> to vector<8x6xf32>
    %12 = arith.addf %9, %11 : vector<8x6xf32>
    %cst_11 = arith.constant 2.000000e+01 : f32
    %13 = vector.broadcast %cst_11 : f32 to vector<8x6xf32>
    %14 = arith.cmpf ogt, %12, %13 : vector<8x6xf32>
    %cst_12 = arith.constant 2.000000e+01 : f32
    %15 = vector.broadcast %cst_12 : f32 to vector<8x6xf32>
    %16 = arith.minimumf %12, %15 : vector<8x6xf32>
    %17 = math.exp %16 : vector<8x6xf32>
    %18 = math.log1p %17 : vector<8x6xf32>
    %19 = arith.select %14, %12, %18 : vector<8x6xi1>, vector<8x6xf32>
    %cst_13 = arith.constant 5.000000e-01 : f32
    %20 = vector.broadcast %cst_13 : f32 to vector<8x6xf32>
    %21 = arith.mulf %19, %20 : vector<8x6xf32>
    %cst_14 = arith.constant 1.000000e+00 : f32
    %22 = vector.broadcast %cst_14 : f32 to vector<8x6xf32>
    %23 = arith.minimumf %21, %22 : vector<8x6xf32>
    %c0_15 = arith.constant 0 : index
    %c0_16 = arith.constant 0 : index
    %24 = vector.load %arg11[%c0_15, %c0_16] : memref<8x6xf32, #tpu.memory_space<vmem>>, vector<8x6xf32>
    %25 = arith.mulf %24, %23 : vector<8x6xf32>
    %c0_17 = arith.constant 0 : index
    %c0_18 = arith.constant 0 : index
    %26 = vector.load %arg12[%c0_17, %c0_18] : memref<1x6xf32, #tpu.memory_space<vmem>>, vector<1x6xf32>
    %27 = vector.broadcast %26 : vector<1x6xf32> to vector<8x6xf32>
    %28 = arith.addf %25, %27 : vector<8x6xf32>
    %cst_19 = arith.constant 2.000000e+01 : f32
    %29 = vector.broadcast %cst_19 : f32 to vector<8x6xf32>
    %30 = arith.cmpf ogt, %28, %29 : vector<8x6xf32>
    %cst_20 = arith.constant 2.000000e+01 : f32
    %31 = vector.broadcast %cst_20 : f32 to vector<8x6xf32>
    %32 = arith.minimumf %28, %31 : vector<8x6xf32>
    %33 = math.exp %32 : vector<8x6xf32>
    %34 = math.log1p %33 : vector<8x6xf32>
    %35 = arith.select %30, %28, %34 : vector<8x6xi1>, vector<8x6xf32>
    %c0_21 = arith.constant 0 : index
    %c0_22 = arith.constant 0 : index
    %c0_23 = arith.constant 0 : index
    %36 = vector.load %arg6[%c0_21, %c0_22, %c0_23] : memref<6x8x40xf32, #tpu.memory_space<vmem>>, vector<6x8x40xf32>
    %c0_24 = arith.constant 0 : index
    %c0_25 = arith.constant 0 : index
    %c0_26 = arith.constant 0 : index
    %37 = vector.load %arg7[%c0_24, %c0_25, %c0_26] : memref<6x40x32xf32, #tpu.memory_space<vmem>>, vector<6x40x32xf32>
    "tpu.trace_start"() <{level = 10 : i32, message = "vbd,vdh->vbh"}> : () -> ()
    %cst_27 = arith.constant dense<0.000000e+00> : vector<6x8x32xf32>
    %38 = tpu.matmul %36, %37, %cst_27 {dimension_numbers = #tpu.dot_dimension_numbers<[2], [1], [1], [2], [0, 0, 0, 1, 1, 2], [0], [0]>} : vector<6x8x40xf32>, vector<6x40x32xf32>, vector<6x8x32xf32> -> vector<6x8x32xf32>
    "tpu.trace_stop"() : () -> ()
    %c0_28 = arith.constant 0 : index
    %c0_29 = arith.constant 0 : index
    %c0_30 = arith.constant 0 : index
    %39 = vector.load %arg8[%c0_28, %c0_29, %c0_30] : memref<6x1x32xf32, #tpu.memory_space<vmem>>, vector<6x1x32xf32>
    %40 = vector.broadcast %39 : vector<6x1x32xf32> to vector<6x8x32xf32>
    %41 = arith.addf %38, %40 : vector<6x8x32xf32>
    %cst_31 = arith.constant 0.000000e+00 : f32
    %42 = vector.broadcast %cst_31 : f32 to vector<6x8x32xf32>
    %43 = arith.maximumf %41, %42 : vector<6x8x32xf32>
    %c0_32 = arith.constant 0 : index
    %c0_33 = arith.constant 0 : index
    %c0_34 = arith.constant 0 : index
    %44 = vector.load %arg9[%c0_32, %c0_33, %c0_34] : memref<6x32x10xf32, #tpu.memory_space<vmem>>, vector<6x32x10xf32>
    "tpu.trace_start"() <{level = 10 : i32, message = "vbh,vhc->vbc"}> : () -> ()
    %cst_35 = arith.constant dense<0.000000e+00> : vector<6x8x10xf32>
    %45 = tpu.matmul %43, %44, %cst_35 {dimension_numbers = #tpu.dot_dimension_numbers<[2], [1], [1], [2], [0, 0, 0, 1, 1, 2], [0], [0]>} : vector<6x8x32xf32>, vector<6x32x10xf32>, vector<6x8x10xf32> -> vector<6x8x10xf32>
    "tpu.trace_stop"() : () -> ()
    %c0_36 = arith.constant 0 : index
    %c0_37 = arith.constant 0 : index
    %c0_38 = arith.constant 0 : index
    %46 = vector.load %arg10[%c0_36, %c0_37, %c0_38] : memref<6x1x10xf32, #tpu.memory_space<vmem>>, vector<6x1x10xf32>
    %47 = vector.broadcast %46 : vector<6x1x10xf32> to vector<6x8x10xf32>
    %48 = arith.addf %45, %47 : vector<6x8x10xf32>
    %cst_39 = arith.constant 2.000000e+01 : f32
    %49 = vector.broadcast %cst_39 : f32 to vector<6x8x10xf32>
    %50 = arith.cmpf ogt, %48, %49 : vector<6x8x10xf32>
    %cst_40 = arith.constant 2.000000e+01 : f32
    %51 = vector.broadcast %cst_40 : f32 to vector<6x8x10xf32>
    %52 = arith.minimumf %48, %51 : vector<6x8x10xf32>
    %53 = math.exp %52 : vector<6x8x10xf32>
    %54 = math.log1p %53 : vector<6x8x10xf32>
    %55 = arith.select %50, %48, %54 : vector<6x8x10xi1>, vector<6x8x10xf32>
    %cst_41 = arith.constant 0.000000e+00 : f32
    %56 = vector.broadcast %cst_41 : f32 to vector<8x10xf32>
    %57 = vector.extract_strided_slice %55 {offsets = [0, 0, 0], sizes = [1, 8, 10], strides = [1, 1, 1]} : vector<6x8x10xf32> to vector<1x8x10xf32>
    %58 = vector.shape_cast %57 : vector<1x8x10xf32> to vector<8x10xf32>
    %59 = vector.extract_strided_slice %35 {offsets = [0, 0], sizes = [8, 1], strides = [1, 1]} : vector<8x6xf32> to vector<8x1xf32>
    %60 = vector.broadcast %59 : vector<8x1xf32> to vector<8x10xf32>
    %61 = arith.mulf %58, %60 : vector<8x10xf32>
    %62 = arith.addf %56, %61 : vector<8x10xf32>
    %63 = vector.extract_strided_slice %55 {offsets = [1, 0, 0], sizes = [1, 8, 10], strides = [1, 1, 1]} : vector<6x8x10xf32> to vector<1x8x10xf32>
    %64 = vector.shape_cast %63 : vector<1x8x10xf32> to vector<8x10xf32>
    %65 = vector.extract_strided_slice %35 {offsets = [0, 1], sizes = [8, 1], strides = [1, 1]} : vector<8x6xf32> to vector<8x1xf32>
    %66 = vector.broadcast %65 : vector<8x1xf32> to vector<8x10xf32>
    %67 = arith.mulf %64, %66 : vector<8x10xf32>
    %68 = arith.addf %62, %67 : vector<8x10xf32>
    %69 = vector.extract_strided_slice %55 {offsets = [2, 0, 0], sizes = [1, 8, 10], strides = [1, 1, 1]} : vector<6x8x10xf32> to vector<1x8x10xf32>
    %70 = vector.shape_cast %69 : vector<1x8x10xf32> to vector<8x10xf32>
    %71 = vector.extract_strided_slice %35 {offsets = [0, 2], sizes = [8, 1], strides = [1, 1]} : vector<8x6xf32> to vector<8x1xf32>
    %72 = vector.broadcast %71 : vector<8x1xf32> to vector<8x10xf32>
    %73 = arith.mulf %70, %72 : vector<8x10xf32>
    %74 = arith.addf %68, %73 : vector<8x10xf32>
    %75 = vector.extract_strided_slice %55 {offsets = [3, 0, 0], sizes = [1, 8, 10], strides = [1, 1, 1]} : vector<6x8x10xf32> to vector<1x8x10xf32>
    %76 = vector.shape_cast %75 : vector<1x8x10xf32> to vector<8x10xf32>
    %77 = vector.extract_strided_slice %35 {offsets = [0, 3], sizes = [8, 1], strides = [1, 1]} : vector<8x6xf32> to vector<8x1xf32>
    %78 = vector.broadcast %77 : vector<8x1xf32> to vector<8x10xf32>
    %79 = arith.mulf %76, %78 : vector<8x10xf32>
    %80 = arith.addf %74, %79 : vector<8x10xf32>
    %81 = vector.extract_strided_slice %55 {offsets = [4, 0, 0], sizes = [1, 8, 10], strides = [1, 1, 1]} : vector<6x8x10xf32> to vector<1x8x10xf32>
    %82 = vector.shape_cast %81 : vector<1x8x10xf32> to vector<8x10xf32>
    %83 = vector.extract_strided_slice %35 {offsets = [0, 4], sizes = [8, 1], strides = [1, 1]} : vector<8x6xf32> to vector<8x1xf32>
    %84 = vector.broadcast %83 : vector<8x1xf32> to vector<8x10xf32>
    %85 = arith.mulf %82, %84 : vector<8x10xf32>
    %86 = arith.addf %80, %85 : vector<8x10xf32>
    %87 = vector.extract_strided_slice %55 {offsets = [5, 0, 0], sizes = [1, 8, 10], strides = [1, 1, 1]} : vector<6x8x10xf32> to vector<1x8x10xf32>
    %88 = vector.shape_cast %87 : vector<1x8x10xf32> to vector<8x10xf32>
    %89 = vector.extract_strided_slice %35 {offsets = [0, 5], sizes = [8, 1], strides = [1, 1]} : vector<8x6xf32> to vector<8x1xf32>
    %90 = vector.broadcast %89 : vector<8x1xf32> to vector<8x10xf32>
    %91 = arith.mulf %88, %90 : vector<8x10xf32>
    %92 = arith.addf %86, %91 : vector<8x10xf32>
    %cst_42 = arith.constant 0.000000e+00 : f32
    %93 = vector.broadcast %cst_42 : f32 to vector<8x52xf32>
    %94 = tpu.concatenate %58, %64, %70, %76, %82, %88, %19, %92, %93 in 1 : vector<8x10xf32>, vector<8x10xf32>, vector<8x10xf32>, vector<8x10xf32>, vector<8x10xf32>, vector<8x10xf32>, vector<8x6xf32>, vector<8x10xf32>, vector<8x52xf32> -> vector<8x128xf32>
    %c0_43 = arith.constant 0 : index
    %c0_44 = arith.constant 0 : index
    %95 = vector.load %arg13[%c0_43, %c0_44] : memref<8x128xf32, #tpu.memory_space<vmem>>, vector<8x128xf32>
    tpu.vector_store %arg13[%c0_43, %c0_44], %94 {strides = array<i32>} : memref<8x128xf32, #tpu.memory_space<vmem>>, vector<8x128xf32>,
    return
  }
  func.func @transform_0(%arg0: i32) -> (i32, i32) {
    %c0_i32 = arith.constant 0 : i32
    %c0_i32_0 = arith.constant 0 : i32
    %c0_i32_1 = arith.constant 0 : i32
    return %c0_i32, %c0_i32_0 : i32, i32
  }
  func.func @transform_1(%arg0: i32) -> (i32, i32) {
    %c0_i32 = arith.constant 0 : i32
    %c0_i32_0 = arith.constant 0 : i32
    %c0_i32_1 = arith.constant 0 : i32
    return %c0_i32, %c0_i32_0 : i32, i32
  }
  func.func @transform_2(%arg0: i32) -> (i32, i32) {
    %c0_i32 = arith.constant 0 : i32
    %c0_i32_0 = arith.constant 0 : i32
    %c0_i32_1 = arith.constant 0 : i32
    return %c0_i32, %c0_i32_0 : i32, i32
  }
  func.func @transform_3(%arg0: i32) -> (i32, i32) {
    %c0_i32 = arith.constant 0 : i32
    %c0_i32_0 = arith.constant 0 : i32
    %c0_i32_1 = arith.constant 0 : i32
    return %c0_i32, %c0_i32_0 : i32, i32
  }
  func.func @transform_4(%arg0: i32) -> (i32, i32) {
    %c0_i32 = arith.constant 0 : i32
    %c0_i32_0 = arith.constant 0 : i32
    %c0_i32_1 = arith.constant 0 : i32
    return %c0_i32, %c0_i32_0 : i32, i32
  }
  func.func @transform_5(%arg0: i32) -> (i32, i32, i32) {
    %c0_i32 = arith.constant 0 : i32
    %c0_i32_0 = arith.constant 0 : i32
    %c0_i32_1 = arith.constant 0 : i32
    %c0_i32_2 = arith.constant 0 : i32
    return %c0_i32, %c0_i32_0, %c0_i32_1 : i32, i32, i32
  }
  func.func @transform_6(%arg0: i32) -> (i32, i32, i32) {
    %c0_i32 = arith.constant 0 : i32
    %c0_i32_0 = arith.constant 0 : i32
    %c0_i32_1 = arith.constant 0 : i32
    %c0_i32_2 = arith.constant 0 : i32
    return %c0_i32, %c0_i32_0, %c0_i32_1 : i32, i32, i32
  }
  func.func @transform_7(%arg0: i32) -> (i32, i32, i32) {
    %c0_i32 = arith.constant 0 : i32
    %c0_i32_0 = arith.constant 0 : i32
    %c0_i32_1 = arith.constant 0 : i32
    %c0_i32_2 = arith.constant 0 : i32
    return %c0_i32, %c0_i32_0, %c0_i32_1 : i32, i32, i32
  }
  func.func @transform_8(%arg0: i32) -> (i32, i32, i32) {
    %c0_i32 = arith.constant 0 : i32
    %c0_i32_0 = arith.constant 0 : i32
    %c0_i32_1 = arith.constant 0 : i32
    %c0_i32_2 = arith.constant 0 : i32
    return %c0_i32, %c0_i32_0, %c0_i32_1 : i32, i32, i32
  }
  func.func @transform_9(%arg0: i32) -> (i32, i32, i32) {
    %c0_i32 = arith.constant 0 : i32
    %c0_i32_0 = arith.constant 0 : i32
    %c0_i32_1 = arith.constant 0 : i32
    %c0_i32_2 = arith.constant 0 : i32
    return %c0_i32, %c0_i32_0, %c0_i32_1 : i32, i32, i32
  }
  func.func @transform_10(%arg0: i32) -> (i32, i32) {
    %c0_i32 = arith.constant 0 : i32
    %c0_i32_0 = arith.constant 0 : i32
    %c0_i32_1 = arith.constant 0 : i32
    return %c0_i32, %c0_i32_0 : i32, i32
  }
  func.func @transform_11(%arg0: i32) -> (i32, i32) {
    %c0_i32 = arith.constant 0 : i32
    %c0_i32_0 = arith.constant 0 : i32
    %c0_i32_1 = arith.constant 0 : i32
    return %c0_i32, %c0_i32_0 : i32, i32
  }
  func.func @transform_12(%arg0: i32) -> (i32, i32) {
    %c0_i32 = arith.constant 0 : i32
    %c0_i32_0 = arith.constant 0 : i32
    %c0_i32_1 = arith.constant 0 : i32
    return %c0_i32, %c0_i32_0 : i32, i32
  }
}

</mosaic_0001>

<bundles_post_ra>
// kernel: _forward_impl.1
= control target key start
LH: loop header
LB: loop body
LE: loop exit
PB: predicated region body
PF: predicated region fallthrough
CT: control target
= control target key end

     0   :  { %v1925_v3 = vmov 0.0   ;;  %vm64_vm0 = vcmask 1043456   ;;  %vm60_vm1 = vcmask 162816   ;;  %v1926_v15 = vmov 0.0|0.0   ;;  %s1935_s29 = smov 20   ;;  %s1936_s30 = smov 40   ;;  %s2456_s1 = inlined_call_operand.vmem [shape: f32[20,256], index: 1, kind: input, shape index: {}]   ;;  %s2457_s6 = inlined_call_operand.vmem [shape: f32[6,40,32], index: 6, kind: input, shape index: {}]   ;;  %s2458_s0 = inlined_call_operand.vmem [shape: f32[8,20], index: 0, kind: input, shape index: {}]   ;;  %s2459_s3 = inlined_call_operand.vmem [shape: f32[256,6], index: 3, kind: input, shape index: {}]   ;;  %s2460_s5 = inlined_call_operand.vmem [shape: f32[6,8,40], index: 5, kind: input, shape index: {}]   ;;  %s2461_s8 = inlined_call_operand.vmem [shape: f32[6,32,10], index: 8, kind: input, shape index: {}]   ;;  %s2462_s2 = inlined_call_operand.vmem [shape: f32[1,256], index: 2, kind: input, shape index: {}]   ;;  %s2463_s7 = inlined_call_operand.vmem [shape: f32[6,1,32], index: 7, kind: input, shape index: {}]   ;;  %s2464_s4 = inlined_call_operand.vmem [shape: f32[1,6], index: 4, kind: input, shape index: {}]   ;;  %s2465_s9 = inlined_call_operand.vmem [shape: f32[6,1,10], index: 9, kind: input, shape index: {}]   ;;  %s2466_s10 = inlined_call_operand.vmem [shape: f32[8,6], index: 10, kind: input, shape index: {}]   ;;  %s2467_s11 = inlined_call_operand.vmem [shape: f32[1,6], index: 11, kind: input, shape index: {}]   ;;  %s2468_s12 = inlined_call_operand.vmem [shape: f32[8,128], index: 12, kind: output, shape index: {}]  }
   0x1   :  { %v43_v0 = vld [vmem:[%s2456_s1 + $0x8] sm:$0xff]  ;;  %v45_v1 = vld [vmem:[%s2456_s1 + $0x18] sm:$0xff]  ;;  %v42_v2 = vld [vmem:[%s2456_s1] sm:$0xff]  ;;  %135 = vmatprep.mubr.f32.mxu0 %v1925_v3  ;;  %vm1927_vm2 = vmmov 0   ;;  %vm371_vm3 = vcmask 326656   ;;  %vm882_vm4 = vcmask 261120  }
   0x2   :  { %v1763_v4 = vpack.c.bf16 %v45_v1, %v43_v0  ;;  %v44_v5 = vld [vmem:[%s2456_s1 + $0x10] sm:$0xff]  ;;  %v47_v7 = vld [vmem:[%s2456_s1 + $0x28] sm:$0xf]  ;;  %v299_v8 = vld [vmem:[%s2457_s6] sm:$0xff]  ;;  %s1937_s13 = smov 60   ;;  %s1940_s18 = smov 66  }
   0x3   :  { %v1765_v6 = vpack.c.bf16 %v44_v5, %v42_v2  ;;  %v300_v9 = vld [vmem:[%s2457_s6 + $0x8] sm:$0xff]  ;;  %v46_v10 = vld [vmem:[%s2456_s1 + $0x20] sm:$0xf]  ;;  %v301_v13 = vld [vmem:[%s2457_s6 + $0x10] sm:$0xff] }
   0x4   :  { %1764 = vmatprep.subr.bf16.mxu0 %v1763_v4  ;;  %v41_v11 = vld [vmem:[%s2458_s0] sm:$0xff]  ;;  %v1800_v12 = vpack.c.bf16 %v300_v9, %v299_v8  ;;  %v302_v14 = vld [vmem:[%s2457_s6 + $0x18] sm:$0xff]  ;;  %v161_v18 = vld [vmem:[%s2459_s3 + $0x88] sm:$0xff] }
   0x5   :  { %1766 = vmatpush1.bf16.msra.mxu0 %v1765_v6  ;;  %v1803_v16 = vpack.c.bf16 %v302_v14, %v301_v13  ;;  %v160_v17 = vld [vmem:[%s2459_s3 + $0x80] sm:$0xff]  ;;  %v145_v21 = vld [vmem:[%s2459_s3 + $0x8] sm:$0xff]  ;;  %v162_v22 = vld [vmem:[%s2459_s3 + $0x90] sm:$0xff] }
   0x6   :  { %1489 = vmatprep.subr.msk.mxu0 %vm64_vm0, %v47_v7  ;;  %v1767_v19 = vpack.c.bf16 %v161_v18, %v160_v17  ;;  %v144_v20 = vld [vmem:[%s2459_s3] sm:$0xff]  ;;  %v163_v24 = vld [vmem:[%s2459_s3 + $0x98] sm:$0xff]  ;;  %v146_v25 = vld [vmem:[%s2459_s3 + $0x10] sm:$0xff] }
   0x7   :  { %v1769_v23 = vpack.c.bf16 %v145_v21, %v144_v20  ;;  %v147_v26 = vld [vmem:[%s2459_s3 + $0x18] sm:$0xff]  ;;  %v304_v27 = vld [vmem:[%s2457_s6 + $0x28] sm:$0xff]  ;;  %v305_v28 = vld [vmem:[%s2457_s6 + $0x30] sm:$0xff]  ;;  %v1771_v29 = vpack.c.bf16 %v163_v24, %v162_v22 }
   0x8   :  { %1768 = vmatprep.subr.bf16.mxu1 %v1767_v19  ;;  %v1773_v30 = vpack.c.bf16 %v147_v26, %v146_v25  ;;  %v164_v31 = vld [vmem:[%s2459_s3 + $0xa0] sm:$0xff]  ;;  %v165_v32 = vld [vmem:[%s2459_s3 + $0xa8] sm:$0xff]  ;;  %v1806_v37 = vpack.c.bf16 %v305_v28, %v304_v27  ;;  %v166_v38 = vld [vmem:[%s2459_s3 + $0xb0] sm:$0xff] }
   0x9   :  { %1490 = vmatpush1.msk.msra.mxu0 %vm64_vm0, %v46_v10  ;;  %1770 = vmatpush3.bf16.msra.mxu1 %v1769_v23  ;;  %v303_v33 = vld [vmem:[%s2457_s6 + $0x20] sm:$0xff]  ;;  %v149_v35 = vld [vmem:[%s2459_s3 + $0x28] sm:$0xff]  ;;  %v167_v39 = vld [vmem:[%s2459_s3 + $0xb8] sm:$0xff]  ;;  %v1775_v42 = vpack.c.bf16 %v165_v32, %v164_v31 }
   0xa   :  { %1491 = vmatmul.mubr.msk.f32.vlgmr.msra.gmra.mrb[0].mxu0 %vm60_vm1, %v41_v11  ;;  %1799 = vmatprep.subr.bf16.mxu0 %v1926_v15  ;;  %v148_v34 = vld [vmem:[%s2459_s3 + $0x20] sm:$0xff]  ;;  %v306_v40 = vld [vmem:[%s2457_s6 + $0x38] sm:$0xff]  ;;  %v1779_v44 = vpack.c.bf16 %v167_v39, %v166_v38  ;;  %v150_v45 = vld [vmem:[%s2459_s3 + $0x30] sm:$0xff] }
   0xb   :  { %1801 = vmatpush3.bf16.msra.mxu0 %v1800_v12  ;;  %1629 = vmatprep.mubr.msk.f32.mxu0 %vm1927_vm2, %v1925_v3  ;;  %v293_v36 = vld [vmem:[%s2460_s5] sm:$0xff]  ;;  %v1777_v43 = vpack.c.bf16 %v149_v35, %v148_v34  ;;  %v151_v46 = vld [vmem:[%s2459_s3 + $0x38] sm:$0xff]  ;;  %v169_v49 = vld [vmem:[%s2459_s3 + $0xc8] sm:$0xff]  ;;  %v50_v35 = vlaneseq }
   0xc   :  { %1802 = vmatprep.subr.bf16.mxu0 %v1926_v15  ;;  %1772 = vmatprep.subr.bf16.mxu1 %v1771_v29  ;;  %v307_v41 = vld [vmem:[%s2457_s6 + $0x40] sm:$0xff]  ;;  %v1781_v50 = vpack.c.bf16 %v151_v46, %v150_v45  ;;  %v309_v51 = vld [vmem:[%s2457_s6 + $0x50] sm:$0xff]  ;;  %v310_v52 = vld [vmem:[%s2457_s6 + $0x58] sm:$0xff] }
   0xd   :  { %1774 = vmatpush3.bf16.msra.mxu1 %v1773_v30  ;;  %v1809_v47 = vpack.c.bf16 %v307_v41, %v306_v40  ;;  %v168_v48 = vld [vmem:[%s2459_s3 + $0xc0] sm:$0xff]  ;;  %v153_v55 = vld [vmem:[%s2459_s3 + $0x48] sm:$0xff]  ;;  %v170_v57 = vld [vmem:[%s2459_s3 + $0xd0] sm:$0xff]  ;;  %v1812_v60 = vpack.c.bf16 %v310_v52, %v309_v51 }
   0xe   :  { %1776 = vmatprep.subr.bf16.mxu1 %v1775_v42  ;;  %v1783_v53 = vpack.c.bf16 %v169_v49, %v168_v48  ;;  %v152_v54 = vld [vmem:[%s2459_s3 + $0x40] sm:$0xff]  ;;  %v308_v56 = vld [vmem:[%s2457_s6 + $0x48] sm:$0xff]  ;;  %v171_v58 = vld [vmem:[%s2459_s3 + $0xd8] sm:$0xff] }
   0xf   :  { %1804 = vmatpush3.bf16.msra.mxu0 %v1803_v16  ;;  %v294_v59 = vld [vmem:[%s2460_s5 + $0x8] sm:$0xff]  ;;  %v311_v61 = vld [vmem:[%s2457_s6 + $0x60] sm:$0xff]  ;;  %v1785_v63 = vpack.c.bf16 %v153_v55, %v152_v54  ;;  %v1787_v0 = vpack.c.bf16 %v171_v58, %v170_v57  ;;  %v154_v1 = vld [vmem:[%s2459_s3 + $0x50] sm:$0xff] }
  0x10   :  { %1627 = vmatprep.subr.mxu0 %v1925_v3  ;;  %v312_v62 = vld [vmem:[%s2457_s6 + $0x68] sm:$0xff]  ;;  %v155_v2 = vld [vmem:[%s2459_s3 + $0x58] sm:$0xff]  ;;  %v172_v4 = vld [vmem:[%s2459_s3 + $0xe0] sm:$0xff] }
  0x11   :  { %1778 = vmatpush3.bf16.msra.mxu1 %v1777_v43  ;;  %v173_v5 = vld [vmem:[%s2459_s3 + $0xe8] sm:$0xff]  ;;  %v1815_v6 = vpack.c.bf16 %v312_v62, %v311_v61  ;;  %v1789_v7 = vpack.c.bf16 %v155_v2, %v154_v1  ;;  %v319_v9 = vld [vmem:[%s2457_s6 + $0xa0] sm:$0xff]  ;;  %v313_v13 = vld [vmem:[%s2457_s6 + $0x70] sm:$0xff] }
  0x12   :  { %1780 = vmatprep.subr.bf16.mxu1 %v1779_v44  ;;  %v1791_v8 = vpack.c.bf16 %v173_v5, %v172_v4  ;;  %v320_v10 = vld [vmem:[%s2457_s6 + $0xa8] sm:$0xff]  ;;  %v156_v11 = vld [vmem:[%s2459_s3 + $0x60] sm:$0xff]  ;;  %v295_v14 = vld [vmem:[%s2460_s5 + $0x10] sm:$0xff] }
  0x13   :  { %1628 = vmatpush3.msra.mxu0 %v303_v33  ;;  %v157_v12 = vld [vmem:[%s2459_s3 + $0x68] sm:$0xff]  ;;  %v1824_v16 = vpack.c.bf16 %v320_v10, %v319_v9  ;;  %v321_v17 = vld [vmem:[%s2457_s6 + $0xb0] sm:$0xff]  ;;  %v322_v18 = vld [vmem:[%s2457_s6 + $0xb8] sm:$0xff] }
  0x14   :  { %1805 = vmatprep.subr.bf16.mxu0 %v1926_v15  ;;  %1630 = vmatmul.mubr.msk.f32.vlgmr.msra.gmra.mrb[2].mxu0 %vm371_vm3, %v293_v36  ;;  %v1793_v19 = vpack.c.bf16 %v157_v12, %v156_v11  ;;  %v1827_v20 = vpack.c.bf16 %v322_v18, %v321_v17  ;;  %v323_v21 = vld [vmem:[%s2457_s6 + $0xc0] sm:$0xff]  ;;  %v174_v23 = vld [vmem:[%s2459_s3 + $0xf0] sm:$0xff]  ;;  %v175_v24 = vld [vmem:[%s2459_s3 + $0xf8] sm:$0xff]  ;;  %v51_v36 = vshrl.u32 %v50_v35, 7 }
  0x15   :  { %1807 = vmatpush3.bf16.msra.mxu0 %v1806_v37  ;;  %1642 = vmatprep.mubr.msk.f32.mxu0 %vm1927_vm2, %v1925_v3  ;;  %v297_v22 = vld [vmem:[%s2460_s5 + $0x20] sm:$0xff]  ;;  %v1795_v25 = vpack.c.bf16 %v175_v24, %v174_v23  ;;  %v158_v26 = vld [vmem:[%s2459_s3 + $0x70] sm:$0xff]  ;;  %v159_v27 = vld [vmem:[%s2459_s3 + $0x78] sm:$0xff] }
  0x16   :  { %1808 = vmatprep.subr.bf16.mxu0 %v1926_v15  ;;  %1782 = vmatpush3.bf16.msra.mxu1 %v1781_v50  ;;  %v1797_v28 = vpack.c.bf16 %v159_v27, %v158_v26  ;;  %v816_v29 = vld [vmem:[%s2461_s8] sm:$0xff]  ;;  %v817_v30 = vld [vmem:[%s2461_s8 + $0x8] sm:$0xff]  ;;  %v818_v32 = vld [vmem:[%s2461_s8 + $0x10] sm:$0xff]  ;;  %v52_v37 = vsub.s32 0, %v51_v36  ;;  %v56_v39 = vsub.s32 1, %v51_v36 }
  0x17   :  { %1784 = vmatprep.subr.bf16.mxu1 %v1783_v53  ;;  %v1836_v31 = vpack.c.bf16 %v817_v30, %v816_v29  ;;  %v819_v33 = vld [vmem:[%s2461_s8 + $0x18] sm:$0xff]  ;;  %v48_v38 = vld [vmem:[%s2462_s2] sm:$0x3]  ;;  %v316_v51 = vld [vmem:[%s2457_s6 + $0x88] sm:$0xff] }
  0x18   :  { %v1839_v34 = vpack.c.bf16 %v819_v33, %v818_v32  ;;  %v53_v40 = vrot.slane %v48_v38, %v52_v37  ;;  %v57_v41 = vrot.slane %v48_v38, %v56_v39  ;;  %v314_v45 = vld [vmem:[%s2457_s6 + $0x78] sm:$0xff]  ;;  %v315_v46 = vld [vmem:[%s2457_s6 + $0x80] sm:$0xff]  ;;  %v317_v52 = vld [vmem:[%s2457_s6 + $0x90] sm:$0xff] }
  0x19   :  { %1810 = vmatpush3.bf16.msra.mxu0 %v1809_v47  ;;  %v1818_v49 = vpack.c.bf16 %v315_v46, %v314_v45  ;;  %v1821_v53 = vpack.c.bf16 %v317_v52, %v316_v51  ;;  %v1494_v54 = vld [vmem:[%s2463_s7] ss:$0 sm:$0xff]  ;;  %v324_v58 = vld [vmem:[%s2457_s6 + $0xc8] sm:$0xff]  ;;  %v826_v1 = vld [vmem:[%s2461_s8 + $0x50] sm:$0xff]  ;;  %v1928_v46 = vmov 2  }
  0x1a   :  { %1640 = vmatprep.subr.mxu0 %v1925_v3  ;;  %1786 = vmatpush3.bf16.msra.mxu1 %v1785_v63  ;;  %v824_v55 = vld [vmem:[%s2461_s8 + $0x40] sm:$0xff]  ;;  %v318_v63 = vld [vmem:[%s2457_s6 + $0x98] sm:$0xff]  ;;  %v821_v12 = vld [vmem:[%s2461_s8 + $0x28] sm:$0xff] }
  0x1b   :  { %1788 = vmatprep.subr.bf16.mxu1 %v1787_v0  ;;  %v827_v2 = vld [vmem:[%s2461_s8 + $0x58] sm:$0xff]  ;;  %v820_v11 = vld [vmem:[%s2461_s8 + $0x20] sm:$0xff]  ;;  %v834_v32 = vld [vmem:[%s2461_s8 + $0x90] sm:$0xff]  ;;  %1889 = vset.pattern.permute.xlu1 %v1928_v46 }
  0x1c   :  { %v296_v4 = vld [vmem:[%s2460_s5 + $0x18] sm:$0xff]  ;;  %v1842_v17 = vpack.c.bf16 %v821_v12, %v820_v11  ;;  %v1495_v18 = vld [vmem:[%s2463_s7 + $0x1] ss:$0 sm:$0xff]  ;;  %v1498_v35 = vld [vmem:[%s2463_s7 + $0x4] ss:$0 sm:$0xff] }
  0x1d   :  { %1641 = vmatpush3.msra.mxu0 %v308_v56  ;;  %v825_v56 = vld [vmem:[%s2461_s8 + $0x48] sm:$0xff]  ;;  %v832_v24 = vld [vmem:[%s2461_s8 + $0x80] sm:$0xff]  ;;  %v835_v33 = vld [vmem:[%s2461_s8 + $0x98] sm:$0xff] }
  0x1e   :  { %1811 = vmatprep.subr.bf16.mxu0 %v1926_v15  ;;  %1643 = vmatmul.mubr.msk.f32.vlgmr.msra.gmra.mrb[4].mxu0 %vm371_vm3, %v294_v59  ;;  %v325_v59 = vld [vmem:[%s2457_s6 + $0xd0] sm:$0xff]  ;;  %v1848_v62 = vpack.c.bf16 %v825_v56, %v824_v55  ;;  %v1497_v55 = vld [vmem:[%s2463_s7 + $0x3] ss:$0 sm:$0xff] }
  0x1f   :  { %1813 = vmatpush3.bf16.msra.mxu0 %v1812_v60  ;;  %1655 = vmatprep.mubr.msk.f32.mxu0 %vm1927_vm2, %v1925_v3  ;;  %v1830_v5 = vpack.c.bf16 %v325_v59, %v324_v58  ;;  %v837_v58 = vld [vmem:[%s2461_s8 + $0xa8] sm:$0xff] }
  0x20   :  { %1814 = vmatprep.subr.bf16.mxu0 %v1926_v15  ;;  %1790 = vmatpush3.bf16.msra.mxu1 %v1789_v7  ;;  %v327_v7 = vld [vmem:[%s2457_s6 + $0xe0] sm:$0xff] }
  0x21   :  { %1792 = vmatprep.subr.bf16.mxu1 %v1791_v8  ;;  %v1851_v8 = vpack.c.bf16 %v827_v2, %v826_v1  ;;  %v838_v1 = vld [vmem:[%s2461_s8 + $0xb0] sm:$0xff]  ;;  %v839_v2 = vld [vmem:[%s2461_s8 + $0xb8] sm:$0xff] }
  0x23   :  { %1816 = vmatpush3.bf16.msra.mxu0 %v1815_v6  ;;  %v326_v6 = vld [vmem:[%s2457_s6 + $0xd8] sm:$0xff] }
  0x24   :  { %1653 = vmatprep.subr.mxu0 %v1925_v3  ;;  %1794 = vmatpush3.bf16.msra.mxu1 %v1793_v19  ;;  %v1833_v9 = vpack.c.bf16 %v327_v7, %v326_v6  ;;  %v822_v19 = vld [vmem:[%s2461_s8 + $0x30] sm:$0xff] }
  0x25   :  { %1796 = vmatprep.subr.bf16.mxu1 %v1795_v25  ;;  %v833_v25 = vld [vmem:[%s2461_s8 + $0x88] sm:$0xff] }
  0x26   :  { %v1860_v30 = vpack.c.bf16 %v833_v25, %v832_v24 }
  0x27   :  { %1654 = vmatpush3.msra.mxu0 %v313_v13 }
  0x28   :  { %1823 = vmatprep.subr.bf16.mxu0 %v1926_v15  ;;  %1656 = vmatmul.mubr.msk.f32.vlgmr.msra.gmra.mrb[6].mxu0 %vm371_vm3, %v295_v14  ;;  %v328_v14 = vld [vmem:[%s2457_s6 + $0xe8] sm:$0xff]  ;;  %s1939_s6 = smov 50  }
  0x29   :  { %1825 = vmatpush3.bf16.msra.mxu0 %v1824_v16  ;;  %1681 = vmatprep.mubr.msk.f32.mxu0 %vm1927_vm2, %v1925_v3  ;;  %v298_v16 = vld [vmem:[%s2460_s5 + $0x28] sm:$0xff] }
  0x2a   :  { %1826 = vmatprep.subr.bf16.mxu0 %v1926_v15  ;;  %1798 = vmatpush3.bf16.msra.mxu1 %v1797_v28 }
  0x2b   :  { %1817 = vmatprep.subr.bf16.mxu1 %v1926_v15 }
  0x2d   :  { %1828 = vmatpush3.bf16.msra.mxu0 %v1827_v20  ;;  %v823_v20 = vld [vmem:[%s2461_s8 + $0x38] sm:$0xff] }
  0x2e   :  { %1679 = vmatprep.subr.mxu0 %v1925_v3  ;;  %v1845_v23 = vpack.c.bf16 %v823_v20, %v822_v19 }
  0x31   :  { %1680 = vmatpush3.msra.mxu0 %v323_v21 }
  0x32   :  { %1682 = vmatmul.mubr.msk.f32.vlgmr.msra.gmra.mrb[8].mxu0 %vm371_vm3, %v297_v22  ;;  %1835 = vmatprep.subr.bf16.mxu0 %v1926_v15  ;;  %v1496_v22 = vld [vmem:[%s2463_s7 + $0x2] ss:$0 sm:$0xff] }
  0x33   :  { %1705 = vmatprep.mubr.msk.f32.mxu0 %vm1927_vm2, %v1925_v3  ;;  %1837 = vmatpush3.bf16.msra.mxu0 %v1836_v31 }
  0x34   :  { %1838 = vmatprep.subr.bf16.mxu0 %v1926_v15 }
  0x37   :  { %1840 = vmatpush3.bf16.msra.mxu0 %v1839_v34  ;;  %v1863_v34 = vpack.c.bf16 %v835_v33, %v834_v32 }
  0x38   :  { %1847 = vmatprep.subr.bf16.mxu0 %v1926_v15 }
  0xdd   :  { %v137_v42 = vpop.f32.mrb[0].mxu0 }
  0xde   :  { %v138_v43 = vadd.f32 %v137_v42, %v53_v40  ;;  %v139_v44 = vpop.f32.mrb[1].mxu0  ;;  %v828_v40 = vld [vmem:[%s2461_s8 + $0x60] sm:$0xff] }
  0xdf   :  { %v140_v47 = vadd.f32 %v139_v44, %v57_v41  ;;  %v829_v41 = vld [vmem:[%s2461_s8 + $0x68] sm:$0xff]  ;;  %v831_v44 = vld [vmem:[%s2461_s8 + $0x78] sm:$0xff] }
  0xe0   :  { %v142_v50 = vmax.f32 %v138_v43, 0.0  ;;  %v1854_v42 = vpack.c.bf16 %v829_v41, %v828_v40  ;;  %v830_v43 = vld [vmem:[%s2461_s8 + $0x70] sm:$0xff] }
  0xe1   :  { %v143_v48 = vmax.f32 %v140_v47, 0.0  ;;  %v1857_v45 = vpack.c.bf16 %v831_v44, %v830_v43  ;;  %v1929_v47 = vmov 0  }
  0xe2   :  { %1887 = vset.pattern.permute.xlu0 %v1929_v47 }
  0xe3   :  { %247 = vmatprep.mubr.f32.mxu1 %v143_v48 }
  0xe4   :  { %248 = vmatmul.mubr.f32.vlgmr.msra.gmra.mrb[0].mxu1 %v142_v50 }
  0xe5   :  { %1819 = vmatpush3.bf16.msra.mxu1 %v1818_v49  ;;  %1668 = vmatprep.mubr.msk.f32.mxu1 %vm1927_vm2, %v1925_v3  ;;  %v1492_v49 = vld [vmem:[%s2464_s4] ss:$0 sm:$0xff] }
  0xe6   :  { %1820 = vmatprep.subr.bf16.mxu1 %v1926_v15 }
  0xe7   :  { %v441_v57 = vpop.f32.mrb[2].mxu0 }
  0xe8   :  { %v442_v60 = vadd.f32 %v1494_v54, %v441_v57  ;;  %v1631_v61 = vpop.f32.mrb[3].mxu0  ;;  %v836_v57 = vld [vmem:[%s2461_s8 + $0xa0] sm:$0xff] }
  0xe9   :  { %1822 = vmatpush3.bf16.msra.mxu1 %v1821_v53 }
  0xea   :  { %1666 = vmatprep.subr.mxu1 %v1925_v3  ;;  %v810_v0 = vmax.f32 %v442_v60, 0.0 }
  0xec   :  { %1706 = vmatmul.mubr.msk.f32.vlgmr.msra.gmra.mrb[10].mxu0 %vm882_vm4, %v810_v0 }
  0xed   :  { %1667 = vmatpush3.msra.mxu1 %v318_v63  ;;  %1849 = vmatpush3.bf16.msra.mxu0 %v1848_v62  ;;  %v1866_v63 = vpack.c.bf16 %v837_v58, %v836_v57 }
  0xee   :  { %1669 = vmatmul.mubr.msk.f32.vlgmr.msra.gmra.mrb[2].mxu1 %vm371_vm3, %v296_v4  ;;  %1829 = vmatprep.subr.bf16.mxu1 %v1926_v15  ;;  %v1869_v4 = vpack.c.bf16 %v839_v2, %v838_v1 }
  0xef   :  { %1831 = vmatpush3.bf16.msra.mxu1 %v1830_v5  ;;  %1694 = vmatprep.mubr.msk.f32.mxu1 %vm1927_vm2, %v1925_v3  ;;  %v1499_v5 = vld [vmem:[%s2463_s7 + $0x5] ss:$0 sm:$0xff] }
  0xf0   :  { %1832 = vmatprep.subr.bf16.mxu1 %v1926_v15  ;;  %1850 = vmatprep.subr.bf16.mxu0 %v1926_v15 }
  0xf1   :  { %v514_v10 = vpop.f32.mrb[4].mxu0  ;;  %1852 = vmatpush3.bf16.msra.mxu0 %v1851_v8  ;;  %1727 = vmatprep.mubr.msk.f32.mxu0 %vm1927_vm2, %v1925_v3 }
  0xf2   :  { %v1644_v13 = vpop.f32.mrb[5].mxu0  ;;  %1859 = vmatprep.subr.bf16.mxu0 %v1926_v15  ;;  %v515_v21 = vadd.f32 %v1495_v18, %v514_v10 }
  0xf3   :  { %1834 = vmatpush3.bf16.msra.mxu1 %v1833_v9 }
  0xf4   :  { %1692 = vmatprep.subr.mxu1 %v1925_v3  ;;  %v811_v27 = vmax.f32 %v515_v21, 0.0 }
  0xf7   :  { %1693 = vmatpush3.msra.mxu1 %v328_v14 }
  0xf8   :  { %1695 = vmatmul.mubr.msk.f32.vlgmr.msra.gmra.mrb[4].mxu1 %vm371_vm3, %v298_v16  ;;  %1841 = vmatprep.subr.bf16.mxu1 %v1926_v15 }
  0xf9   :  { %1843 = vmatpush3.bf16.msra.mxu1 %v1842_v17  ;;  %1716 = vmatprep.mubr.msk.f32.mxu1 %vm1927_vm2, %v1925_v3 }
  0xfa   :  { %1844 = vmatprep.subr.bf16.mxu1 %v1926_v15 }
  0xfb   :  { %v587_v26 = vpop.f32.mrb[6].mxu0 }
  0xfc   :  { %v588_v28 = vadd.f32 %v1496_v22, %v587_v26  ;;  %v1657_v29 = vpop.f32.mrb[7].mxu0  ;;  %v269_v26 = vld [vmem:[%s2466_s10] sm:$0xff] }
  0xfd   :  { %1846 = vmatpush3.bf16.msra.mxu1 %v1845_v23  ;;  %v1507_v23 = vld [vmem:[%s2465_s9 + $0x1] ss:$0 sm:$0xff] }
  0xfe   :  { %v812_v31 = vmax.f32 %v588_v28, 0.0  ;;  %1853 = vmatprep.subr.bf16.mxu1 %v1926_v15 }
 0x100   :  { %1717 = vmatmul.mubr.msk.f32.vlgmr.msra.gmra.mrb[6].mxu1 %vm882_vm4, %v811_v27  ;;  %1728 = vmatmul.mubr.msk.f32.vlgmr.msra.gmra.mrb[12].mxu0 %vm882_vm4, %v812_v31  ;;  %v1508_v31 = vld [vmem:[%s2465_s9 + $0x2] ss:$0 sm:$0xff] }
 0x101   :  { %1861 = vmatpush3.bf16.msra.mxu0 %v1860_v30  ;;  %1749 = vmatprep.mubr.msk.f32.mxu0 %vm1927_vm2, %v1925_v3  ;;  %v1493_v30 = vld [vmem:[%s2467_s11] ss:$0 sm:$0xff]  ;;  %s1934_s11 = smov 10  }
 0x102   :  { %1862 = vmatprep.subr.bf16.mxu0 %v1926_v15  ;;  %1738 = vmatprep.mubr.msk.f32.mxu1 %vm1927_vm2, %v1925_v3 }
 0x103   :  { %1855 = vmatpush3.bf16.msra.mxu1 %v1854_v42 }
 0x104   :  { %1856 = vmatprep.subr.bf16.mxu1 %v1926_v15 }
 0x105   :  { %v733_v36 = vpop.f32.mrb[8].mxu0  ;;  %1864 = vmatpush3.bf16.msra.mxu0 %v1863_v34 }
 0x106   :  { %v734_v37 = vadd.f32 %v1498_v35, %v733_v36  ;;  %v1683_v38 = vpop.f32.mrb[9].mxu0  ;;  %v1510_v36 = vld [vmem:[%s2465_s9 + $0x4] ss:$0 sm:$0xff] }
 0x107   :  { %1858 = vmatpush3.bf16.msra.mxu1 %v1857_v45 }
 0x108   :  { %v814_v39 = vmax.f32 %v734_v37, 0.0  ;;  %1865 = vmatprep.subr.bf16.mxu1 %v1926_v15 }
 0x10a   :  { %1750 = vmatmul.mubr.msk.f32.vlgmr.msra.gmra.mrb[14].mxu0 %vm882_vm4, %v814_v39 }
 0x1b7   :  { %v1550_v48 = vpop.f32.mrb[0].mxu1 }
 0x1b8   :  { %v1551_v50 = vpop.f32.mrb[1].mxu1 }
 0x1b9   :  { %v1552_v51 = vadd.f32 %v1551_v50, %v1550_v48 }
 0x1bb   :  { %v250_v52 = vadd.f32 %v1552_v51, %v1492_v49 }
 0x1bd   :  { %v254_v53 = vmin.f32 %v250_v52, 20.0  ;;  %vm253_vm6 = vcmp.gt.f32.partialorder %v250_v52, 20.0 }
 0x1bf   :  { %v255_v54 = vmul.f32 1.442695, %v254_v53  ;;  %v2375_v56 = vpop.f32.mrb[10].mxu0 }
 0x1c0   :  { %v1707_v59 = vpop.f32.mrb[11].mxu0 }
 0x1c1   :  { %1893 = vpow2.f32 %v255_v54  ;;  %v660_v60 = vpop.f32.mrb[2].mxu1 }
 0x1c2   :  { %v661_v61 = vadd.f32 %v1497_v55, %v660_v60  ;;  %v1670_v62 = vpop.f32.mrb[3].mxu1 }
 0x1c4   :  { %v813_v0 = vmax.f32 %v661_v61, 0.0 }
 0x1c6   :  { %1739 = vmatmul.mubr.msk.f32.vlgmr.msra.gmra.mrb[8].mxu1 %vm882_vm4, %v813_v0 }
 0x1c7   :  { %1867 = vmatpush3.bf16.msra.mxu1 %v1866_v63  ;;  %1760 = vmatprep.mubr.msk.f32.mxu1 %vm1927_vm2, %v1925_v3 }
 0x1c8   :  { %1868 = vmatprep.subr.bf16.mxu1 %v1926_v15 }
 0x1cb   :  { %v1894_v6 = vpop.eup %1893  ;;  %v806_v7 = vpop.f32.mrb[4].mxu1  ;;  %1870 = vmatpush3.bf16.msra.mxu1 %v1869_v4  ;;  %v1930_v4 = vmov 3  }
 0x1cc   :  { %v257_v8 = vadd.f32 1.0, %v1894_v6  ;;  %v807_v9 = vadd.f32 %v1499_v5, %v806_v7  ;;  %v1696_v10 = vpop.f32.mrb[5].mxu1  ;;  %v260_v12 = vmul.f32 -0.5, %v1894_v6  ;;  %v263_v17 = vand.u32 2147483647, %v1894_v6 }
 0x1cd   :  { %v1931_v5 = vmov 1  }
 0x1ce   :  { %1895 = vlog2.f32 %v257_v8  ;;  %v815_v11 = vmax.f32 %v807_v9, 0.0  ;;  %v261_v15 = vadd.f32 1.0, %v260_v12  ;;  %vm264_vm5 = vcmp.lt.f32.partialorder %v263_v17, 0.0004427343 }
 0x1cf   :  { %v1932_v17 = vmov 4  }
 0x1d0   :  { %1761 = vmatmul.mubr.msk.f32.vlgmr.msra.gmra.mrb[10].mxu1 %vm882_vm4, %v815_v11  ;;  %v262_v20 = vmul.f32 %v1894_v6, %v261_v15 }
 0x1d3   :  { %v1025_v13 = vpop.f32.mrb[6].mxu1  ;;  %v1098_v14 = vpop.f32.mrb[12].mxu0 }
 0x1d4   :  { %v1729_v3 = vpop.f32.mrb[13].mxu0  ;;  %v1718_v16 = vpop.f32.mrb[7].mxu1  ;;  %v2406_v29 = vadd.f32 %v1507_v23, %v1025_v13  ;;  %v2415_v35 = vadd.f32 %v1508_v31, %v1098_v14 }
 0x1d6   :  { %v1328_v34 = vmin.f32 %v2406_v29, 20.0  ;;  %v1329_v40 = vmin.f32 %v2415_v35, 20.0  ;;  %vm1322_vm10 = vcmp.gt.f32.partialorder %v2406_v29, 20.0  ;;  %vm1323_vm12 = vcmp.gt.f32.partialorder %v2415_v35, 20.0 }
 0x1d8   :  { %v1896_v18 = vpop.eup %1895  ;;  %v1335_v39 = vmul.f32 1.442695, %v1328_v34  ;;  %v1337_v42 = vmul.f32 1.442695, %v1329_v40 }
 0x1d9   :  { %v259_v19 = vmul.f32 0.6931472, %v1896_v18  ;;  %v1933_v18 = vmov 5  }
 0x1db   :  { %v265_v21 = vsel %vm264_vm5, %v262_v20, %v259_v19 }
 0x1dc   :  { %v2397_v22 = vsel %vm253_vm6, %v250_v52, %v265_v21 }
 0x1dd   :  { %v267_v24 = vmul.f32 0.5, %v2397_v22  ;;  %v1244_v25 = vpop.f32.mrb[14].mxu0 }
 0x1de   :  { %v1751_v27 = vpop.f32.mrb[15].mxu0  ;;  %v2421_v41 = vadd.f32 %v1510_v36, %v1244_v25 }
 0x1df   :  { %v268_v28 = vmin.f32 %v267_v24, 1.0 }
 0x1e0   :  { %v1331_v43 = vmin.f32 %v2421_v41, 20.0  ;;  %vm1325_vm14 = vcmp.gt.f32.partialorder %v2421_v41, 20.0 }
 0x1e1   :  { %v270_v32 = vmul.f32 %v269_v26, %v268_v28  ;;  %v1506_v28 = vld [vmem:[%s2465_s9] ss:$0 sm:$0xff] }
 0x1e2   :  { %v1341_v44 = vmul.f32 1.442695, %v1331_v43 }
 0x1e3   :  { %v278_v33 = vadd.f32 %v1493_v30, %v270_v32  ;;  %v1509_v32 = vld [vmem:[%s2465_s9 + $0x3] ss:$0 sm:$0xff] }
 0x1e5   :  { %v280_v37 = vmin.f32 %v278_v33, 20.0  ;;  %vm279_vm8 = vcmp.gt.f32.partialorder %v278_v33, 20.0 }
 0x1e7   :  { %v281_v38 = vmul.f32 1.442695, %v280_v37 }
 0x1e9   :  { %1897 = vpow2.f32 %v281_v38 }
 0x1ea   :  { %1899 = vpow2.f32 %v1335_v39 }
 0x1eb   :  { %1901 = vpow2.f32 %v1337_v42 }
 0x1ec   :  { %1903 = vpow2.f32 %v1341_v44 }
 0x1f3   :  { %v1898_v45 = vpop.eup %1897 }
 0x1f4   :  { %v283_v46 = vadd.f32 1.0, %v1898_v45  ;;  %v1900_v47 = vpop.eup %1899  ;;  %v286_v50 = vmul.f32 -0.5, %v1898_v45  ;;  %v289_v54 = vand.u32 2147483647, %v1898_v45 }
 0x1f5   :  { %v1354_v48 = vadd.f32 1.0, %v1900_v47  ;;  %v1902_v49 = vpop.eup %1901  ;;  %v1357_v60 = vmul.f32 -0.5, %v1900_v47  ;;  %v1360_v2 = vand.u32 2147483647, %v1900_v47 }
 0x1f6   :  { %1905 = vlog2.f32 %v283_v46  ;;  %v1363_v51 = vadd.f32 1.0, %v1902_v49  ;;  %v1904_v52 = vpop.eup %1903  ;;  %v287_v53 = vadd.f32 1.0, %v286_v50  ;;  %vm290_vm7 = vcmp.lt.f32.partialorder %v289_v54, 0.0004427343 }
 0x1f7   :  { %1907 = vlog2.f32 %v1354_v48  ;;  %v1381_v57 = vadd.f32 1.0, %v1904_v52  ;;  %v1358_v63 = vadd.f32 1.0, %v1357_v60  ;;  %v1366_v0 = vmul.f32 -0.5, %v1902_v49 }
 0x1f8   :  { %1909 = vlog2.f32 %v1363_v51  ;;  %v288_v59 = vmul.f32 %v1898_v45, %v287_v53  ;;  %v1384_v9 = vmul.f32 -0.5, %v1904_v52  ;;  %vm2424_vm9 = vcmp.lt.f32.partialorder %v1360_v2, 0.0004427343 }
 0x1f9   :  { %1911 = vlog2.f32 %v1381_v57  ;;  %v1359_v7 = vmul.f32 %v1900_v47, %v1358_v63  ;;  %v1367_v8 = vadd.f32 1.0, %v1366_v0  ;;  %v1369_v12 = vand.u32 2147483647, %v1902_v49 }
 0x1fa   :  { %v1385_v16 = vadd.f32 1.0, %v1384_v9  ;;  %v1387_v19 = vand.u32 2147483647, %v1904_v52 }
 0x1fb   :  { %v1368_v3 = vmul.f32 %v1902_v49, %v1367_v8  ;;  %vm1370_vm11 = vcmp.lt.f32.partialorder %v1369_v12, 0.0004427343 }
 0x1fc   :  { %v1386_v24 = vmul.f32 %v1904_v52, %v1385_v16  ;;  %vm1388_vm13 = vcmp.lt.f32.partialorder %v1387_v19, 0.0004427343 }
 0x200   :  { %v1906_v55 = vpop.eup %1905 }
 0x201   :  { %v285_v58 = vmul.f32 0.6931472, %v1906_v55  ;;  %v1908_v1 = vpop.eup %1907 }
 0x202   :  { %v1356_v6 = vmul.f32 0.6931472, %v1908_v1  ;;  %v1910_v10 = vpop.eup %1909 }
 0x203   :  { %v291_v61 = vsel %vm290_vm7, %v288_v59, %v285_v58  ;;  %v1365_v14 = vmul.f32 0.6931472, %v1910_v10  ;;  %v1912_v15 = vpop.eup %1911  ;;  %vm1470_vm7 = vcmask 80896  }
 0x204   :  { %v292_v62 = vsel %vm279_vm8, %v278_v33, %v291_v61  ;;  %v1362_v13 = vsel %vm2424_vm9, %v1359_v7, %v1356_v6  ;;  %v1383_v23 = vmul.f32 0.6931472, %v1912_v15  ;;  %vm1473_vm8 = vcmask 244736  }
 0x205   :  { %1419 = vperm.xlu1 %1889, %v292_v62   ;;  %1407 = vperm.xlu0 %1887, %v292_v62   ;;  %v1400_v20 = vsel %vm1322_vm10, %v2406_v29, %v1362_v13  ;;  %v1371_v21 = vsel %vm1370_vm11, %v1368_v3, %v1365_v14  ;;  %v953_v29 = vadd.f32 %v1506_v28, %v2375_v56  ;;  %v1511_v56 = vld [vmem:[%s2465_s9 + $0x5] ss:$0 sm:$0xff]  ;;  %s1938_s9 = smov 30   ;;  %vm1476_vm9 = vcmask 408576  }
 0x206   :  { %v1401_v25 = vsel %vm1323_vm12, %v2415_v35, %v1371_v21  ;;  %v1389_v26 = vsel %vm1388_vm13, %v1386_v24, %v1383_v23  ;;  %vm1478_vm10 = vcmask 490496   ;;  %vm1480_vm11 = vcmask 539648  }
 0x207   :  { %v2436_v27 = vsel %vm1325_vm14, %v2421_v41, %v1389_v26  ;;  %v1327_v30 = vmin.f32 %v953_v29, 20.0  ;;  %vm1321_vm0 = vcmp.gt.f32.partialorder %v953_v29, 20.0  ;;  %vm1482_vm12 = vcmask 621568  }
 0x209   :  { %1890 = vset.pattern.permute.xlu1 %v1930_v4  ;;  %1888 = vset.pattern.permute.xlu0 %v1931_v5  ;;  %v1333_v31 = vmul.f32 1.442695, %v1327_v30 }
 0x20a   :  { %1425 = vperm.xlu1 %1890, %v292_v62   ;;  %1413 = vperm.xlu0 %1888, %v292_v62  }
 0x20b   :  { %1913 = vpow2.f32 %v1333_v31 }
 0x20e   :  { %1891 = vset.pattern.permute.xlu1 %v1932_v17  ;;  %1892 = vset.pattern.permute.xlu0 %v1933_v18 }
 0x20f   :  { %1431 = vperm.xlu1 %1891, %v292_v62   ;;  %1437 = vperm.xlu0 %1892, %v292_v62  }
 0x213   :  { %1443 = vrot.lane.b32.xlu1 %v1400_v20, %s1934_s11 }
 0x215   :  { %v1914_v33 = vpop.eup %1913 }
 0x216   :  { %v1345_v37 = vadd.f32 1.0, %v1914_v33  ;;  %v1348_v40 = vmul.f32 -0.5, %v1914_v33  ;;  %v1351_v47 = vand.u32 2147483647, %v1914_v33 }
 0x217   :  { %1447 = vrot.lane.b32.xlu1 %v1401_v25, %s1935_s29 }
 0x218   :  { %1915 = vlog2.f32 %v1345_v37  ;;  %v1349_v44 = vadd.f32 1.0, %v1348_v40  ;;  %vm1352_vm15 = vcmp.lt.f32.partialorder %v1351_v47, 0.0004427343 }
 0x21a   :  { %v1350_v52 = vmul.f32 %v1914_v33, %v1349_v44 }
 0x21b   :  { %1455 = vrot.lane.b32.xlu1 %v2436_v27, %s1936_s30 }
 0x21f   :  { %1463 = vrot.lane.b32.xlu1 %v2397_v22, %s1937_s13 }
 0x222   :  { %v1916_v46 = vpop.eup %1915 }
 0x223   :  { %v1347_v51 = vmul.f32 0.6931472, %v1916_v46 }
 0x225   :  { %v1353_v53 = vsel %vm1352_vm15, %v1350_v52, %v1347_v51 }
 0x226   :  { %v1399_v57 = vsel %vm1321_vm0, %v953_v29, %v1353_v53 }
 0x284   :  { %v1408_v49 = vpop.permute.xlu0 %1407  ;;  %v1420_v61 = vpop.permute.xlu1 %1419 }
 0x285   :  { %v1410_v0 = vmul.f32 %v1408_v49, %v1399_v57  ;;  %v1422_v6 = vmul.f32 %v1420_v61, %v1401_v25 }
 0x289   :  { %v1414_v55 = vpop.permute.xlu0 %1413  ;;  %v1426_v9 = vpop.permute.xlu1 %1425 }
 0x28a   :  { %v1416_v59 = vmul.f32 %v1414_v55, %v1400_v20 }
 0x28c   :  { %v1417_v2 = vadd.f32 %v1416_v59, %v1410_v0 }
 0x28e   :  { %v1423_v11 = vadd.f32 %v1422_v6, %v1417_v2  ;;  %v1432_v15 = vpop.permute.xlu1 %1431  ;;  %v1438_v21 = vpop.permute.xlu0 %1437 }
 0x28f   :  { %v1434_v19 = vmul.f32 %v1432_v15, %v2436_v27 }
 0x292   :  { %v1444_v28 = vpop.permute.xlu1 %1443 }
 0x293   :  { %v1471_v31 = vsel %vm1470_vm7, %v1399_v57, %v1444_v28 }
 0x296   :  { %v1448_v29 = vpop.permute.xlu1 %1447 }
 0x299   :  { %v1171_v34 = vpop.f32.mrb[8].mxu1 }
 0x29a   :  { %v1172_v35 = vadd.f32 %v1509_v32, %v1171_v34  ;;  %v1740_v36 = vpop.f32.mrb[9].mxu1  ;;  %v1472_v32 = vsel %vm60_vm1, %v1471_v31, %v1448_v29  ;;  %v1456_v27 = vpop.permute.xlu1 %1455 }
 0x29c   :  { %v1330_v38 = vmin.f32 %v1172_v35, 20.0  ;;  %vm1324_vm4 = vcmp.gt.f32.partialorder %v1172_v35, 20.0 }
 0x29e   :  { %v1339_v22 = vmul.f32 1.442695, %v1330_v38  ;;  %v1464_v37 = vpop.permute.xlu1 %1463 }
 0x2a0   :  { %1917 = vpow2.f32 %v1339_v22 }
 0x2a3   :  { %v1317_v39 = vpop.f32.mrb[10].mxu1 }
 0x2a4   :  { %v1318_v41 = vadd.f32 %v1511_v56, %v1317_v39  ;;  %v1762_v42 = vpop.f32.mrb[11].mxu1 }
 0x2a6   :  { %v1332_v43 = vmin.f32 %v1318_v41, 20.0  ;;  %vm1326_vm6 = vcmp.gt.f32.partialorder %v1318_v41, 20.0 }
 0x2a8   :  { %v1343_v45 = vmul.f32 1.442695, %v1332_v43 }
 0x2aa   :  { %v1918_v48 = vpop.eup %1917  ;;  %1919 = vpow2.f32 %v1343_v45 }
 0x2ab   :  { %v1372_v50 = vadd.f32 1.0, %v1918_v48  ;;  %v1375_v54 = vmul.f32 -0.5, %v1918_v48  ;;  %v1378_v62 = vand.u32 2147483647, %v1918_v48 }
 0x2ad   :  { %1921 = vlog2.f32 %v1372_v50  ;;  %v1376_v60 = vadd.f32 1.0, %v1375_v54  ;;  %vm1379_vm2 = vcmp.lt.f32.partialorder %v1378_v62, 0.0004427343 }
 0x2af   :  { %v1377_v5 = vmul.f32 %v1918_v48, %v1376_v60 }
 0x2b4   :  { %v1920_v58 = vpop.eup %1919 }
 0x2b5   :  { %v1390_v63 = vadd.f32 1.0, %v1920_v58  ;;  %v1393_v8 = vmul.f32 -0.5, %v1920_v58  ;;  %v1396_v3 = vand.u32 2147483647, %v1920_v58 }
 0x2b7   :  { %v1922_v1 = vpop.eup %1921  ;;  %1923 = vlog2.f32 %v1390_v63  ;;  %v1394_v14 = vadd.f32 1.0, %v1393_v8  ;;  %vm1397_vm5 = vcmp.lt.f32.partialorder %v1396_v3, 0.0004427343 }
 0x2b8   :  { %v1374_v4 = vmul.f32 0.6931472, %v1922_v1 }
 0x2b9   :  { %v1395_v18 = vmul.f32 %v1920_v58, %v1394_v14 }
 0x2ba   :  { %v1380_v7 = vsel %vm1379_vm2, %v1377_v5, %v1374_v4 }
 0x2bb   :  { %v1402_v10 = vsel %vm1324_vm4, %v1172_v35, %v1380_v7 }
 0x2bc   :  { %v1428_v12 = vmul.f32 %v1426_v9, %v1402_v10  ;;  %1451 = vrot.lane.b32.xlu0 %v1402_v10, %s1938_s9 }
 0x2be   :  { %v1429_v13 = vadd.f32 %v1428_v12, %v1423_v11 }
 0x2c0   :  { %v1435_v25 = vadd.f32 %v1434_v19, %v1429_v13 }
 0x2c1   :  { %v1924_v16 = vpop.eup %1923 }
 0x2c2   :  { %v1392_v17 = vmul.f32 0.6931472, %v1924_v16 }
 0x2c4   :  { %v1398_v20 = vsel %vm1397_vm5, %v1395_v18, %v1392_v17 }
 0x2c5   :  { %v1404_v23 = vsel %vm1326_vm6, %v1318_v41, %v1398_v20 }
 0x2c6   :  { %1459 = vrot.lane.b32.xlu0 %v1404_v23, %s1939_s6  ;;  %v1440_v24 = vmul.f32 %v1438_v21, %v1404_v23 }
 0x2c8   :  { %v1441_v26 = vadd.f32 %v1440_v24, %v1435_v25 }
 0x2ca   :  { %1467 = vrot.lane.b32.xlu0 %v1441_v26, %s1940_s18 }
 0x32e   :  { %v1452_v30 = vpop.permute.xlu0 %1451 }
 0x32f   :  { %v1474_v33 = vsel %vm1473_vm8, %v1472_v32, %v1452_v30 }
 0x330   :  { %v1475_v34 = vsel %vm371_vm3, %v1474_v33, %v1456_v27 }
 0x338   :  { %v1460_v35 = vpop.permute.xlu0 %1459 }
 0x339   :  { %v1477_v36 = vsel %vm1476_vm9, %v1475_v34, %v1460_v35 }
 0x33a   :  { %v1479_v38 = vsel %vm1478_vm10, %v1477_v36, %v1464_v37 }
 0x33c   :  { %v1468_v22 = vpop.permute.xlu0 %1467 }
 0x33d   :  { %v1481_v56 = vsel %vm1480_vm11, %v1479_v38, %v1468_v22 }
 0x33e   :  { %v1483_v39 = vsel %vm1482_vm12, %v1481_v56, 0.0 }
 0x33f   :  { %1484 = vst [vmem:[%s2468_s12] sm:$0xff] %v1483_v39 }

</bundles_post_ra>
